<compile_context>
chip_gen: v7x
topology: tpu7x:2x2x1
jax: 0.10.0
libtpu: 0.0.40
codegen_flags: <defaults>
</compile_context>

<pallas_src>
import functools

import jax
import jax.numpy as jnp
from jax.experimental import pallas as pl
from jax.experimental.pallas import tpu as pltpu


def _light_channel_attn_kernel(x_ref, w1_ref, w2_ref, o_ref, *, hw_true, hw_pad):
    # x_ref : (Bt, C, HWp)  lane-dense block (spatial collapsed onto lanes, padded to 128k)
    # w1_ref: (C, Cr)       fc1 weight, pre-transposed in the wrapper
    # w2_ref: (Cr, C)       fc2 weight, pre-transposed in the wrapper
    xv = x_ref[...]                                                    # native dtype, no f32 copy

    # --- pooled path (tiny, done in f32) ---------------------------------------
    # mean: zero-padded lanes do not affect the sum; divide by the true HW.
    x_sum = jnp.sum(xv, axis=-1, dtype=jnp.float32)                    # (Bt, C) f32 accumulation
    x_mean = x_sum * (1.0 / float(hw_true))
    # max: mask pad lanes to -inf (only when padding exists; static branch).
    if hw_pad != hw_true:
        lane = jax.lax.broadcasted_iota(jnp.int32, xv.shape, 2)
        xv_m = jnp.where(lane < hw_true, xv, jnp.asarray(-jnp.inf, xv.dtype))
    else:
        xv_m = xv
    x_max = jnp.max(xv_m, axis=-1).astype(jnp.float32)                 # (Bt, C)

    pool = 0.5 * x_mean + 0.5 * x_max                                  # (Bt, C)

    # fc1 (1x1 conv, no bias) + ReLU, then fc2 (1x1 conv, no bias), then sigmoid.
    h = jnp.maximum(
        jnp.dot(pool, w1_ref[...], preferred_element_type=jnp.float32), 0.0)    # (Bt, Cr)
    attn = jax.nn.sigmoid(
        jnp.dot(h, w2_ref[...], preferred_element_type=jnp.float32))            # (Bt, C)

    # --- gate -------------------------------------------------------------------
    # Re-read x_ref (don't hold the big block live across the FC section) and
    # multiply in the native dtype; only the tiny attn vector is cast.
    o_ref[...] = x_ref[...] * attn[:, :, None].astype(o_ref.dtype)


def light_channel_attn(x, fc1_w, fc2_w, *, batch_block=None):
    """x: (B, C, H, W) NCHW; fc1_w: (Cr, C, 1, 1); fc2_w: (C, Cr, 1, 1) (OIHW, bias=False)."""
    B, C, H, W = x.shape
    HW = H * W
    Cr = fc1_w.shape[0]

    # Lane-dense view; pad the lane axis to a multiple of 128 so the output store
    # is an unmasked full vst (pads are zero -> sum unaffected; max masked in-kernel).
    hw_pad = ((HW + 127) // 128) * 128
    x2 = x.reshape(B, C, HW)
    if hw_pad != HW:
        x2 = jnp.pad(x2, ((0, 0), (0, 0), (0, hw_pad - HW)))

    # ---- batch blocking: aim for ~2 MiB x-blocks and a multi-step grid ---------
    bytes_per_batch = C * hw_pad * x.dtype.itemsize
    if batch_block is None:
        target_block_bytes = 2 << 20                                   # ~2 MiB per x block
        batch_block = max(1, target_block_bytes // max(1, bytes_per_batch))
        # Guarantee a multi-step grid so the pipeline overlaps DMA/compute and
        # v7x can shard blocks across its 2 TensorCores.
        if B >= 4:
            batch_block = min(batch_block, max(1, B // 4))
        elif B >= 2:
            batch_block = min(batch_block, max(1, B // 2))
    batch_block = int(max(1, min(batch_block, B)))
    grid = (pl.cdiv(B, batch_block),)

    # 1x1 conv weights -> plain matmul weights, pre-transposed so the kernel needs
    # no in-kernel transposes:  fc1: (Cr,C,1,1) -> (C,Cr);  fc2: (C,Cr,1,1) -> (Cr,C).
    w1_t = fc1_w.reshape(Cr, C).T.astype(jnp.float32)
    w2_t = fc2_w.reshape(C, Cr).T.astype(jnp.float32)

    kernel = functools.partial(_light_channel_attn_kernel, hw_true=HW, hw_pad=hw_pad)

    # Scoped-VMEM budget: 2x(in block) + 2x(out block) + tiny weights. With ~2 MiB
    # blocks this stays far under 32 MiB, which is safe on v5e/v6e/v7x alike.
    vmem_limit_bytes = 32 * 1024 * 1024

    out2 = pl.pallas_call(
        kernel,
        out_shape=jax.ShapeDtypeStruct((B, C, hw_pad), x.dtype),
        grid=grid,
        in_specs=[
            pl.BlockSpec((batch_block, C, hw_pad), lambda b: (b, 0, 0)),   # batch block of x
            pl.BlockSpec(memory_space=pltpu.MemorySpace.VMEM),             # fc1 weight (tiny, resident)
            pl.BlockSpec(memory_space=pltpu.MemorySpace.VMEM),             # fc2 weight (tiny, resident)
        ],
        out_specs=pl.BlockSpec((batch_block, C, hw_pad), lambda b: (b, 0, 0)),
        compiler_params=pltpu.CompilerParams(
            dimension_semantics=("parallel",),                             # batch blocks independent
            vmem_limit_bytes=vmem_limit_bytes,
        ),
    )(x2, w1_t, w2_t)

    if hw_pad != HW:
        out2 = out2[:, :, :HW]
    return out2.reshape(B, C, H, W)


def reference(x, fc1_w, fc2_w):
    """Pure-JAX reference mirroring the PyTorch LightChannelAttn.forward."""
    x_pool = (0.5 * jnp.mean(x, axis=(2, 3), keepdims=True)
              + 0.5 * jnp.max(x, axis=(2, 3), keepdims=True))              # (B, C, 1, 1)
    dn = ("NCHW", "OIHW", "NCHW")
    h = jax.lax.conv_general_dilated(x_pool, fc1_w, (1, 1), "VALID", dimension_numbers=dn)
    h = jnp.maximum(h, 0.0)                                                # ReLU (inplace in torch)
    attn = jax.lax.conv_general_dilated(h, fc2_w, (1, 1), "VALID", dimension_numbers=dn)
    return x * jax.nn.sigmoid(attn)


if __name__ == "__main__":
    key = jax.random.PRNGKey(0)
    kx, k1, k2, kx2 = jax.random.split(key, 4)

    # Small shapes consistent with the module: channels must be divisible by reduction.
    B, C, H, W = 2, 32, 16, 16
    reduction = 8
    Cr = C // reduction

    x = jax.random.normal(kx, (B, C, H, W), jnp.float32)
    fc1_w = jax.random.normal(k1, (Cr, C, 1, 1), jnp.float32) * 0.1        # Conv2d(C, C//r, 1, bias=False)
    fc2_w = jax.random.normal(k2, (C, Cr, 1, 1), jnp.float32) * 0.1        # Conv2d(C//r, C, 1, bias=False)

    out = jax.block_until_ready(light_channel_attn(x, fc1_w, fc2_w))
    ref = reference(x, fc1_w, fc2_w)
    assert out.shape == x.shape and out.dtype == x.dtype
    assert jnp.allclose(out, ref, atol=1e-4, rtol=1e-4)

    # Exercise the lane-padding path (H*W = 196, not a multiple of 128).
    xp = jax.random.normal(kx2, (B, C, 14, 14), jnp.float32)
    out_p = jax.block_until_ready(light_channel_attn(xp, fc1_w, fc2_w))
    ref_p = reference(xp, fc1_w, fc2_w)
    assert out_p.shape == xp.shape and out_p.dtype == xp.dtype
    assert jnp.allclose(out_p, ref_p, atol=1e-4, rtol=1e-4)

    print("KERNEL_OK")
</pallas_src>

<mosaic_0001>
module attributes {stable_mosaic.version = 11 : i64} {
  func.func @_light_channel_attn_kernel(%arg0: i32, %arg1: memref<1x32x256xf32, #tpu.memory_space<vmem>>, %arg2: memref<32x4xf32, #tpu.memory_space<vmem>>, %arg3: memref<4x32xf32, #tpu.memory_space<vmem>>, %arg4: memref<1x32x256xf32, #tpu.memory_space<vmem>>) attributes {dimension_semantics = [#tpu.dimension_semantics<parallel>], iteration_bounds = array<i64: 2>, scalar_prefetch = 0 : i64, scratch_operands = 0 : i64, tpu.core_type = #tpu.core_type<tc>, window_params = [{transform_indices = @transform_0, window_bounds = array<i64: 1, 32, 256>}, {pipeline_mode = #tpu.pipeline_mode<synchronous>, transform_indices = @transform_1, window_bounds = array<i64: 32, 4>}, {pipeline_mode = #tpu.pipeline_mode<synchronous>, transform_indices = @transform_2, window_bounds = array<i64: 4, 32>}, {transform_indices = @transform_3, window_bounds = array<i64: 1, 32, 256>}]} {
    %c0 = arith.constant 0 : index
    %c0_0 = arith.constant 0 : index
    %c0_1 = arith.constant 0 : index
    %0 = vector.load %arg1[%c0, %c0_0, %c0_1] : memref<1x32x256xf32, #tpu.memory_space<vmem>>, vector<1x32x256xf32>
    %cst = arith.constant dense<0.000000e+00> : vector<1x32xf32>
    %1 = vector.multi_reduction <add>, %0, %cst [2] : vector<1x32x256xf32> to vector<1x32xf32>
    %cst_2 = arith.constant 3.906250e-03 : f32
    %2 = vector.broadcast %cst_2 : f32 to vector<1x32xf32>
    %3 = arith.mulf %1, %2 : vector<1x32xf32>
    %cst_3 = arith.constant dense<0xFF800000> : vector<1x32xf32>
    %4 = vector.multi_reduction <maximumf>, %0, %cst_3 [2] : vector<1x32x256xf32> to vector<1x32xf32>
    %cst_4 = arith.constant 5.000000e-01 : f32
    %5 = vector.broadcast %cst_4 : f32 to vector<1x32xf32>
    %6 = arith.mulf %5, %3 : vector<1x32xf32>
    %cst_5 = arith.constant 5.000000e-01 : f32
    %7 = vector.broadcast %cst_5 : f32 to vector<1x32xf32>
    %8 = arith.mulf %7, %4 : vector<1x32xf32>
    %9 = arith.addf %6, %8 : vector<1x32xf32>
    %c0_6 = arith.constant 0 : index
    %c0_7 = arith.constant 0 : index
    %10 = vector.load %arg2[%c0_6, %c0_7] : memref<32x4xf32, #tpu.memory_space<vmem>>, vector<32x4xf32>
    %cst_8 = arith.constant dense<0.000000e+00> : vector<1x4xf32>
    %11 = tpu.matmul %9, %10, %cst_8 {dimension_numbers = #tpu.dot_dimension_numbers<[1], [0], [0], [1], [0, 0, 1, 1], [], []>} : vector<1x32xf32>, vector<32x4xf32>, vector<1x4xf32> -> vector<1x4xf32>
    %cst_9 = arith.constant 0.000000e+00 : f32
    %12 = vector.broadcast %cst_9 : f32 to vector<1x4xf32>
    %13 = arith.maximumf %11, %12 : vector<1x4xf32>
    %c0_10 = arith.constant 0 : index
    %c0_11 = arith.constant 0 : index
    %14 = vector.load %arg3[%c0_10, %c0_11] : memref<4x32xf32, #tpu.memory_space<vmem>>, vector<4x32xf32>
    %cst_12 = arith.constant dense<0.000000e+00> : vector<1x32xf32>
    %15 = tpu.matmul %13, %14, %cst_12 {dimension_numbers = #tpu.dot_dimension_numbers<[1], [0], [0], [1], [0, 0, 1, 1], [], []>} : vector<1x4xf32>, vector<4x32xf32>, vector<1x32xf32> -> vector<1x32xf32>
    %16 = arith.negf %15 : vector<1x32xf32>
    %17 = math.exp %16 : vector<1x32xf32>
    %cst_13 = arith.constant 1.000000e+00 : f32
    %18 = vector.broadcast %cst_13 : f32 to vector<1x32xf32>
    %19 = arith.addf %18, %17 : vector<1x32xf32>
    %20 = arith.divf %18, %19 : vector<1x32xf32>
    %c0_14 = arith.constant 0 : index
    %c0_15 = arith.constant 0 : index
    %c0_16 = arith.constant 0 : index
    %21 = vector.load %arg1[%c0_14, %c0_15, %c0_16] : memref<1x32x256xf32, #tpu.memory_space<vmem>>, vector<1x32x256xf32>
    %22 = vector.shape_cast %20 : vector<1x32xf32> to vector<1x32x1xf32>
    %23 = vector.broadcast %22 : vector<1x32x1xf32> to vector<1x32x256xf32>
    %24 = arith.mulf %21, %23 : vector<1x32x256xf32>
    %c0_17 = arith.constant 0 : index
    %c0_18 = arith.constant 0 : index
    %c0_19 = arith.constant 0 : index
    %25 = vector.load %arg4[%c0_17, %c0_18, %c0_19] : memref<1x32x256xf32, #tpu.memory_space<vmem>>, vector<1x32x256xf32>
    tpu.vector_store %arg4[%c0_17, %c0_18, %c0_19], %24 {strides = array<i32>} : memref<1x32x256xf32, #tpu.memory_space<vmem>>, vector<1x32x256xf32>,
    return
  }
  func.func @transform_0(%arg0: i32) -> (i32, i32, i32) {
    %c0_i32 = arith.constant 0 : i32
    %c0_i32_0 = arith.constant 0 : i32
    %c0_i32_1 = arith.constant 0 : i32
    return %arg0, %c0_i32, %c0_i32_0 : i32, i32, i32
  }
  func.func @transform_1(%arg0: i32) -> (i32, i32) {
    %c0_i32 = arith.constant 0 : i32
    %c0_i32_0 = arith.constant 0 : i32
    %c0_i32_1 = arith.constant 0 : i32
    return %c0_i32, %c0_i32_0 : i32, i32
  }
  func.func @transform_2(%arg0: i32) -> (i32, i32) {
    %c0_i32 = arith.constant 0 : i32
    %c0_i32_0 = arith.constant 0 : i32
    %c0_i32_1 = arith.constant 0 : i32
    return %c0_i32, %c0_i32_0 : i32, i32
  }
  func.func @transform_3(%arg0: i32) -> (i32, i32, i32) {
    %c0_i32 = arith.constant 0 : i32
    %c0_i32_0 = arith.constant 0 : i32
    %c0_i32_1 = arith.constant 0 : i32
    return %arg0, %c0_i32, %c0_i32_0 : i32, i32, i32
  }
}

</mosaic_0001>

<bundles_post_ra>
// kernel: tpu_custom_call.1
= control target key start
LH: loop header
LB: loop body
LE: loop exit
PB: predicated region body
PF: predicated region fallthrough
CT: control target
= control target key end

     0   :  { %8 = vsyncpa [#allocation3], 0  ;;  %s1007_s0 = inlined_call_operand.hbm [shape: f32[2,32,256], index: 0, kind: input, shape index: {}]   ;;  %s1008_s1 = inlined_call_operand.vmem [shape: f32[32,4], index: 1, kind: input, shape index: {}]   ;;  %s1009_s2 = inlined_call_operand.vmem [shape: f32[4,32], index: 2, kind: input, shape index: {}]   ;;  %s1010_s3 = inlined_call_operand.hbm [shape: f32[2,32,256], index: 3, kind: output, shape index: {}]  }
   0x1   :  { %10 = vsyncpa [#allocation3 + $0x1], 0 }
   0x2   :  { %11 = vsyncpa [#allocation4], 0 }
   0x3   :  { %13 = vsyncpa [#allocation4 + $0x1], 0  ;;  %s786_s12 = smov 0   ;;  %s788_s13 = smov 0  }
   0x4   :  { %s790_s14 = smov 0   ;;  %s792_s15 = smov 0  }
   0x5 LB: > { %s807_s16 = sadd.s32 4294967295, %s755_s15   ;;  %s553_s17 = sadd.s32 4294967294, %s755_s15   ;;  %s755_s15 = sphi %s792_s15, %s1023_s15   ;;  %s751_s14 = sphi %s790_s14, %s1022_s14   ;;  %s747_s13 = sphi %s788_s13, %s1021_s13   ;;  %s743_s12 = sphi %s786_s12, %s1020_s12  }
   0x6   : > { %s811_s18 = sadd.s32 1, %s755_s15   ;;  %s26_s19 = sadd.s32 1, %s751_s14 }
   0x7   : > { %s23_s20 = ssub.s32 %s755_s15, %s811_s18  ;;  %p33_p0 = scmp.ne.s32.totalorder %s751_s14, %s747_s13 }
   0x8   : > { %p24_p1 = scmp.eq.s32.totalorder %s23_s20, 0  ;;  %p34_p2 = scmp.eq.s32.totalorder %s755_s15, 0 }
   0x9   : > { %p39_p3 = scmp.ne.s32.totalorder %s747_s13, %s743_s12  ;;  %p40_p4 = scmp.eq.s32.totalorder %s807_s16, 0 }
   0xa   : > { %s823_s21 = scalar_select %p24_p1, %s751_s14, %s26_s19  }
   0xb   : > { %p825_p5 = por %p34_p2, %p33_p0  ;;  %p829_p6 = por %p40_p4, %p39_p3 }
   0xc   : > { %p105_p7 = scmp.eq.s32.totalorder %s807_s16, 1  ;;  %p111_p8 = scmp.eq.s32.totalorder %s553_s17, 1 }
   0xd   : > { %p614_p10 = scmp.lt.s32.totalorder %s755_s15, 2  ;;  %s137_s26 = sand.u32 1, %s751_s14  }
   0xe   : > { %p836_p11 = por %p105_p7, %p33_p0  ;;  %p840_p12 = por %p111_p8, %p39_p3 }
   0xf   : > { %s571_s27 = sshll.u32 %s755_s15, 10  ;;  %s556_s28 = sshll.u32 %s137_s26, 6 }
  0x10   : > { %s1014_s24 = scalar_select %p836_p11, 1, 0 }
  0x11   : > { %s1015_s25 = scalar_select %p840_p12, 1, 0 }
  0x12   : > { %s849_s4 = scalar_lea.hbm %s1007_s0, %s571_s27  ;;  %s141_s5 = scalar_lea.vmem [#allocation2], %s556_s28 }
  0x13   : > { %s148_s6 = sshll.u32 %s141_s5, 4  ;;  %p853_p13 = pnand %p614_p10, %p825_p5  ;;  %s857_s6 = int_to_ptr.vmem [resolvable:$true] %s148_s6 }
  0x14   : > { %s859_s8 = scalar_lea.sflag [#allocation3], %s137_s26  ;;  %s659_s9 = scalar_lea.hbm %s849_s4, 1024 }
  0x15   : > { %p660_p0 = scmp.ne.s32.totalorder %s849_s4, %s659_s9  ;;  %p661_p1 = pneg %p853_p13 }
  0x16   : > { %s664_s17 = scalar_lea.hbm %s1007_s0, 2048  ;;  %p665_p4 = scmp.lt.u32.totalorder %s849_s4, %s1007_s0 }
  0x17   : > { %p662_p2 = pnand %p661_p1, %p660_p0  ;;  %p666_p5 = scmp.lt.u32.totalorder %s664_s17, %s659_s9 }
  0x18   : > { %p668_p8 = scmp.lt.u32.totalorder %s659_s9, %s849_s4 }
  0x19   : > { %p663_p3 = pneg %p662_p2  ;;  %p667_p7 = por %p666_p5, %p665_p4 }
  0x1b   : > { %p669_p10 = por %p668_p8, %p667_p7 }
  0x1d   : > { %p670_p9 = pnand %p669_p10, %p663_p3 }
  0x1f   : > { %673 = shalt.err (!%p670_p9)
}
  0x20   : > { %s674_s22 = scalar_lea.vmem %s857_s6, 1024  ;;  %s757_s26 = smov [#allocation2]  }
  0x21   : > { %p675_p0 = scmp.ne.s32.totalorder %s857_s6, %s674_s22  ;;  %s679_s27 = sshll.u32 %s757_s26, 4  ;;  %s680_s27 = int_to_ptr.vmem [resolvable:$false] %s679_s27 }
  0x22   : > { %s681_s28 = scalar_lea.vmem %s680_s27, 2048  ;;  %p682_p11 = scmp.lt.s32.totalorder %s857_s6, %s680_s27 }
  0x23   : > { %p677_p2 = pnand %p675_p0, %p661_p1  ;;  %p683_p4 = scmp.lt.s32.totalorder %s681_s28, %s674_s22 }
  0x25   : > { %p678_p12 = pneg %p677_p2  ;;  %p684_p5 = por %p683_p4, %p682_p11 }
  0x27   : > { %p685_p7 = pnand %p684_p5, %p678_p12 }
  0x29   : > { %688 = shalt.err (!%p685_p7)
}
  0x2a   : > { %s758_s29 = smov 256   ;;  %s759_s30 = smov 16  }
  0x2b   : > { %609 = dma.hbm_to_vmem [thread:$0]  (!%p853_p13), %s849_s4, 1024, %s857_s6, %s859_s8, %s758_s29, %s758_s29, %s759_s30  }
  0x2c   : > { %p559_p9 = scmp.ge.s32.totalorder %s755_s15, 1  ;;  %p156_p1 = scmp.lt.s32.totalorder %s755_s15, 3 }
  0x2e   : > { %p157_p3 = pnand %p559_p9, %p156_p1 }
  0x2f   : > { %s890_s5 = sand.u32 (!%p157_p3), 1, %s747_s13  }
  0x30   : > { %160 = sbr.rel (%p157_p3) target bundleno = 816 (0x330), region = 32  ;;  %s560_s9 = sshll.u32 (!%p157_p3), %s890_s5, 6 }
  0x31   : > { %s163_s10 = scalar_lea.sflag (!%p157_p3), [#allocation3], %s890_s5  ;;  %s166_s11 = scalar_lea.vmem (!%p157_p3), [#allocation2], %s560_s9 }
  0x37   : > { %734 = dma.done.wait (%p829_p6), %s163_s10, 1024  }
  0x38   : > { %736 = vsyncadd (%p829_p6), %s163_s10, 4294966272  ;;  %v900_v0 = vld [vmem:[%s166_s11 + $0x20] sm:$0xff]  ;;  %v902_v1 = vld [vmem:[%s166_s11 + $0x28] sm:$0xff]  ;;  %v760_v19 = vmov 0.0|0.0   ;;  %vm761_vm0 = vmmov 0   ;;  %v762_v23 = vmov 0.0   ;;  %v245_v24 = vlaneseq }
  0x39   : > { %v904_v2 = vld [vmem:[%s166_s11] sm:$0xff]  ;;  %v203_v3 = vadd.f32 %v902_v1, %v900_v0  ;;  %v908_v4 = vld [vmem:[%s166_s11 + $0x8] sm:$0xff]  ;;  %v910_v5 = vld [vmem:[%s166_s11 + $0x30] sm:$0xff]  ;;  %v219_v15 = vmax.f32 %v900_v0, %v902_v1  ;;  %596 = vmatprep.subr.bf16.mxu0 %v760_v19  ;;  %588 = vmatprep.mubr.msk.f32.mxu0 %vm761_vm0, %v762_v23  ;;  %vm256_vm1 = vcmask 130112   ;;  %vm263_vm2 = vcmask 195712   ;;  %s188_s27 = scalar_lea.vmem [#allocation5], %s560_s9 }
  0x3a   : > { %v912_v6 = vld [vmem:[%s166_s11 + $0x38] sm:$0xff]  ;;  %v197_v7 = vadd.f32 %v908_v4, %v904_v2  ;;  %v916_v8 = vld [vmem:[%s166_s11 + $0x10] sm:$0xff]  ;;  %v213_v13 = vmax.f32 %v904_v2, %v908_v4  ;;  %v237_v16 = vld [vmem:[%s1008_s1] sm:$0xff]  ;;  %591 = vmatprep.subr.mxu1 %v762_v23  ;;  %593 = vmatprep.mubr.msk.f32.mxu1 %vm761_vm0, %v762_v23  ;;  %v246_v27 = vand.u32 127, %v245_v24  ;;  %v248_v32 = vshrl.u32 %v245_v24, 7  ;;  %s480_s28 = sshll.u32 %s188_s27, 4  ;;  %s956_s28 = int_to_ptr.vmem [resolvable:$true] %s480_s28 }
  0x3b   : > { %v918_v9 = vld [vmem:[%s166_s11 + $0x18] sm:$0xff]  ;;  %204 = vadd.xlane.f32.xlu1 %v203_v3  ;;  %v206_v10 = vadd.f32 %v912_v6, %v910_v5  ;;  %v222_v14 = vmax.f32 %v910_v5, %v912_v6  ;;  %v238_v17 = vld [vmem:[%s1008_s1 + $0x8] sm:$0xff]  ;;  %v239_v20 = vld [vmem:[%s1008_s1 + $0x10] sm:$0xff]  ;;  %vm270_vm3 = vcmask 261312   ;;  %vm272_vm4 = vcmask 261120   ;;  %s572_s29 = sshll.u32 %s807_s16, 10 }
  0x3c   : > { %198 = vadd.xlane.f32.xlu0 %v197_v7  ;;  %v200_v11 = vadd.f32 %v918_v9, %v916_v8  ;;  %v216_v12 = vmax.f32 %v916_v8, %v918_v9  ;;  %v597_v18 = vpack.c.bf16 %v238_v17, %v237_v16  ;;  %v240_v21 = vld [vmem:[%s1008_s1 + $0x18] sm:$0xff]  ;;  %v251_v33 = vadd.s32 4294967288, %v246_v27  ;;  %v346_v7 = vld [vmem:[%s1009_s2] sm:$0xf]  ;;  %s961_s10 = scalar_lea.hbm %s1010_s3, %s572_s29  ;;  %s467_s16 = scalar_lea.sflag [#allocation4], %s890_s5 }
  0x3d   : > { %v600_v22 = vpack.c.bf16 %v240_v21, %v239_v20  ;;  %v265_v39 = vadd.s32 4294967272, %v246_v27  ;;  %v258_v43 = vadd.s32 4294967280, %v246_v27  ;;  %v249_v46 = vsub.s32 %v246_v27, %v248_v32  ;;  %s689_s11 = scalar_lea.vmem %s956_s28, 1024  ;;  %p1017_p11 = scmp.ne.s32.totalorder %s1014_s24, 0 }
  0x3e   : > { %598 = vmatpush3.bf16.msra.mxu0 %v597_v18  ;;  %v254_v44 = vsub.s32 %v251_v33, %v248_v32  ;;  %vm351_vm5 = vcmask 1043456   ;;  %vm347_vm6 = vcmask 31744   ;;  %v433_v18 = vsub.s32 0, %v248_v32  ;;  %p690_p6 = scmp.ne.s32.totalorder %s956_s28, %s689_s11  ;;  %s763_s23 = smov [#allocation5]  }
  0x3f   : > { %207 = vadd.xlane.f32.xlu1 %v206_v10  ;;  %599 = vmatprep.subr.bf16.mxu0 %v760_v19  ;;  %v268_v50 = vsub.s32 %v265_v39, %v248_v32  ;;  %v261_v54 = vsub.s32 %v258_v43, %v248_v32  ;;  %s693_s4 = sshll.u32 %s763_s23, 4  ;;  %s694_s4 = int_to_ptr.vmem [resolvable:$false] %s693_s4 }
  0x40   : > { %201 = vadd.xlane.f32.xlu0 %v200_v11  ;;  %592 = vmatpush3.msk.msra.mxu1 %vm351_vm5, %v346_v7  ;;  %p691_p12 = pnand %p690_p6, %p1017_p11  ;;  %s695_s6 = scalar_lea.vmem %s694_s4, 2048 }
  0x41   : > { %p696_p8 = scmp.lt.s32.totalorder %s956_s28, %s694_s4  ;;  %p697_p10 = scmp.lt.s32.totalorder %s695_s6, %s689_s11 }
  0x42   : > { %601 = vmatpush3.bf16.msra.mxu0 %v600_v22  ;;  %p692_p13 = pneg %p691_p12 }
  0x43   : > { %217 = vmax.xlane.f32.xlu1 %v216_v12  ;;  %p698_p0 = por %p697_p10, %p696_p8 }
  0x44   : > { %214 = vmax.xlane.f32.xlu0 %v213_v13 }
  0x45   : > { %p699_p2 = pnand %p698_p0, %p692_p13 }
  0x47   : > { %223 = vmax.xlane.f32.xlu1 %v222_v14 }
  0x48   : > { %220 = vmax.xlane.f32.xlu0 %v219_v15 }
  0xc8   : > { %v205_v25 = vpop.xlane.xlu1 %204 }
  0xc9   : > { %v199_v26 = vpop.xlane.xlu0 %198  ;;  %v211_v40 = vmul.f32 0.00390625, %v205_v25 }
  0xca   : > { %v209_v30 = vmul.f32 0.00390625, %v199_v26 }
  0xcb   : > { %v227_v53 = vmul.f32 0.5, %v211_v40 }
  0xcc   : > { %v208_v28 = vpop.xlane.xlu1 %207  ;;  %v225_v41 = vmul.f32 0.5, %v209_v30 }
  0xcd   : > { %v202_v29 = vpop.xlane.xlu0 %201  ;;  %v212_v35 = vmul.f32 0.00390625, %v208_v28 }
  0xce   : > { %v210_v31 = vmul.f32 0.00390625, %v202_v29 }
  0xcf   : > { %v228_v49 = vmul.f32 0.5, %v212_v35 }
  0xd0   : > { %v218_v34 = vpop.xlane.xlu1 %217  ;;  %v226_v36 = vmul.f32 0.5, %v210_v31 }
  0xd1   : > { %v230_v37 = vmul.f32 0.5, %v218_v34  ;;  %v215_v38 = vpop.xlane.xlu0 %214 }
  0xd2   : > { %v229_v42 = vmul.f32 0.5, %v215_v38 }
  0xd3   : > { %v234_v45 = vadd.f32 %v230_v37, %v226_v36 }
  0xd4   : > { %v233_v47 = vadd.f32 %v229_v42, %v225_v41  ;;  %v224_v48 = vpop.xlane.xlu1 %223 }
  0xd5   : > { %v232_v51 = vmul.f32 0.5, %v224_v48  ;;  %v221_v52 = vpop.xlane.xlu0 %220  ;;  %v255_v56 = vrot.slane %v234_v45, %v254_v44 }
  0xd6   : > { %v231_v55 = vmul.f32 0.5, %v221_v52  ;;  %v250_v57 = vrot.slane %v233_v47, %v249_v46 }
  0xd7   : > { %v236_v58 = vadd.f32 %v232_v51, %v228_v49 }
  0xd8   : > { %v235_v59 = vadd.f32 %v231_v55, %v227_v53  ;;  %v257_v62 = vsel %vm256_vm1, %v255_v56, %v250_v57 }
  0xd9   : > { %v269_v60 = vrot.slane %v236_v58, %v268_v50 }
  0xda   : > { %v262_v61 = vrot.slane %v235_v59, %v261_v54 }
  0xdc   : > { %v264_v63 = vsel %vm263_vm2, %v262_v61, %v257_v62 }
  0xdd   : > { %v271_v3 = vsel %vm270_vm3, %v269_v60, %v264_v63 }
  0xde   : > { %589 = vmatmul.mubr.msk.f32.vlgmr.msra.gmra.mrb[0].mxu0 %vm272_vm4, %v271_v3 }
 0x1b1   : > { %v341_v10 = vpop.f32.mrb[0].mxu0 }
 0x1b2   : > { %v345_v11 = vmax.f32 %v341_v10, 0.0  ;;  %v590_v12 = vpop.f32.mrb[1].mxu0 }
 0x1b4   : > { %594 = vmatmul.mubr.msk.f32.vlgmr.msra.gmra.mrb[0].mxu1 %vm347_vm6, %v345_v11 }
 0x287   : > { %v421_v13 = vpop.f32.mrb[0].mxu1 }
 0x288   : > { %v565_v14 = vmul.f32 -1.442695, %v421_v13  ;;  %v595_v15 = vpop.f32.mrb[1].mxu1 }
 0x28a   : > { %655 = vpow2.f32 %v565_v14 }
 0x294   : > { %v656_v16 = vpop.eup %655 }
 0x295   : > { %v428_v17 = vadd.f32 1.0, %v656_v16 }
 0x297   : > { %657 = vrcp.f32 %v428_v17 }
 0x2a1   : > { %v658_v19 = vpop.eup %657 }
 0x2a2   : > { %v434_v20 = vrot.slane %v658_v19, %v433_v18 }
 0x2a4   : > { %440 = vbcast.lane.b32.xlu1 %v434_v20, 264  ;;  %436 = vbcast.lane.b32.xlu0 %v434_v20, 256 }
 0x2a8   : > { %444 = vbcast.lane.b32.xlu1 %v434_v20, 272 }
 0x2ac   : > { %448 = vbcast.lane.b32.xlu1 %v434_v20, 280 }
 0x316   : > { %v441_v21 = vpop.permute.xlu1 %440  ;;  %v437_v22 = vpop.permute.xlu0 %436 }
 0x317   : > { %v452_v23 = vmul.f32 %v441_v21, %v916_v8  ;;  %v453_v24 = vmul.f32 %v441_v21, %v918_v9  ;;  %v450_v25 = vmul.f32 %v437_v22, %v904_v2  ;;  %v451_v26 = vmul.f32 %v437_v22, %v908_v4 }
 0x319   : > { %460 = vst [vmem:[%s188_s27 + $0x10] sm:$0xff] %v452_v23  ;;  %461 = vst [vmem:[%s188_s27 + $0x18] sm:$0xff] %v453_v24 }
 0x31a   : > { %458 = vst [vmem:[%s188_s27] sm:$0xff] %v450_v25  ;;  %459 = vst [vmem:[%s188_s27 + $0x8] sm:$0xff] %v451_v26  ;;  %v445_v27 = vpop.permute.xlu1 %444 }
 0x31b   : > { %v454_v28 = vmul.f32 %v445_v27, %v900_v0  ;;  %v455_v8 = vmul.f32 %v445_v27, %v902_v1 }
 0x31d   : > { %462 = vst [vmem:[%s188_s27 + $0x20] sm:$0xff] %v454_v28  ;;  %463 = vst [vmem:[%s188_s27 + $0x28] sm:$0xff] %v455_v8 }
 0x31e   : > { %v449_v2 = vpop.permute.xlu1 %448 }
 0x31f   : > { %v456_v4 = vmul.f32 %v449_v2, %v910_v5  ;;  %v457_v0 = vmul.f32 %v449_v2, %v912_v6 }
 0x321   : > { %464 = vst [vmem:[%s188_s27 + $0x30] sm:$0xff] %v456_v4  ;;  %465 = vst [vmem:[%s188_s27 + $0x38] sm:$0xff] %v457_v0 }
 0x322   : > { %702 = shalt.err (!%p699_p2)
}
 0x323   : > { %s703_s7 = scalar_lea.hbm %s961_s10, 1024  ;;  %s707_s19 = scalar_lea.hbm %s1010_s3, 2048 }
 0x324   : > { %p704_p4 = scmp.ne.s32.totalorder %s961_s10, %s703_s7  ;;  %p708_p9 = scmp.lt.u32.totalorder %s961_s10, %s1010_s3 }
 0x325   : > { %p709_p1 = scmp.lt.u32.totalorder %s707_s19, %s703_s7  ;;  %p711_p6 = scmp.lt.u32.totalorder %s703_s7, %s961_s10 }
 0x326   : > { %p705_p5 = pnand %p704_p4, %p1017_p11 }
 0x327   : > { %p710_p3 = por %p709_p1, %p708_p9 }
 0x328   : > { %p706_p7 = pneg %p705_p5 }
 0x329   : > { %p712_p12 = por %p711_p6, %p710_p3 }
 0x32b   : > { %p713_p13 = pnand %p712_p12, %p706_p7 }
 0x32d   : > { %716 = shalt.err (!%p713_p13)
}
 0x32e   : > { %s764_s26 = smov 256   ;;  %s765_s27 = smov 16  }
 0x32f   : > { %604 = dma.vmem_to_hbm [thread:$0]  (%p1017_p11), %s956_s28, 1024, %s961_s10, %s467_s16, %s764_s26, %s764_s26, %s765_s27  }
 0x330 PF: > { %s495_s29 = sand.u32 1, %s743_s12   ;;  %p1018_p8 = scmp.ne.s32.totalorder %s1015_s25, 0 }
 0x331   : > { %p1019_p10 = scmp.ge.s32.totalorder %s755_s15, 2  ;;  %s496_s30 = scalar_lea.sflag [#allocation4], %s495_s29 }
 0x333   : > { %p611_p0 = pnand %p1019_p10, %p1018_p8 }
 0x335   : > { %738 = dma.done.wait (!%p611_p0), %s496_s30, 1024  }
 0x336   : > { %740 = vsyncadd (!%p611_p0), %s496_s30, 4294966272  ;;  %p16_p2 = scmp.ge.s32.totalorder %s811_s18, 4   ;;  %s1020_s12 = smov %s747_s13 }
 0x337   : > { %s1021_s13 = smov %s751_s14  ;;  %s1022_s14 = smov %s823_s21 }
 0x338   : > { %s1023_s15 = smov %s811_s18  ;;  %18 = sbr.rel (!%p16_p2) target bundleno = 5 (0x5), region = 77 }
 0x33f   :  { %501 = vsyncpa [#allocation3], 1 }
 0x340   :  { %503 = vsyncpa [#allocation3 + $0x1], 1 }
 0x341   :  { %504 = vsyncpa [#allocation4], 1 }
 0x342   :  { %506 = vsyncpa [#allocation4 + $0x1], 1 }

</bundles_post_ra>
